<compile_context>
chip_gen: v5e
topology: v5e:2x2
jax: 0.10.0
libtpu: 0.0.40
codegen_flags: <defaults>
</compile_context>

<pallas_src>
import jax
import jax.numpy as jnp
from jax import lax
from jax.experimental import pallas as pl
from jax.experimental.pallas import tpu as pltpu


def _round_up(x, m):
    return (x + m - 1) // m * m


def _pick_tile(n_edges, max_tile, onehot_nodes=None):
    # Lane-dense output => tile must be a multiple of 128.  Keep >= 4 grid
    # steps when E allows (2 per v7x TensorCore) so each core overlaps DMA of
    # step i+1 with compute of step i.
    tile = _round_up(pl.cdiv(n_edges, 4), 128)
    tile = min(tile, max_tile)
    if onehot_nodes is not None:
        # Bound the two [N, tile] bf16 one-hot intermediates to ~8 MiB.
        cap = (8 * 1024 * 1024) // (4 * max(_round_up(onehot_nodes, 8), 8))
        cap = max(128, cap // 128 * 128)
        tile = min(tile, cap)
    return int(max(tile, 128))


def _const_spec(shape):
    """Constant-index-map BlockSpec, single-buffered (no point double-buffering
    a block that never changes).  Falls back to the default pipeline mode if
    this JAX build's BlockSpec lacks `pipeline_mode`."""
    idx_map = lambda i: (0, 0)
    buffered = getattr(pl, "Buffered", None)
    if buffered is not None:
        try:
            return pl.BlockSpec(shape, idx_map, pipeline_mode=buffered(1))
        except TypeError:
            pass
    return pl.BlockSpec(shape, idx_map)


def _onehot_vmem_bytes(n_nodes, de, hidden, dout, tile_e):
    n_pad = _round_up(max(n_nodes, 8), 8)
    resident = (2 * hidden * n_pad + hidden * de + dout * hidden) * 2 \
               + (hidden + dout) * 4 * 128          # biases padded to a lane
    streamed = 2 * tile_e * (2 * 4 + de * 2 + dout * 4)   # double-buffered
    interm = 2 * n_pad * tile_e * 2 + (hidden + dout) * tile_e * 4
    return resident + streamed + interm


# --------------------------------------------------------------------------
# Kernels (edges on the lane axis; all MXU operands bf16, f32 accumulation).
# --------------------------------------------------------------------------

def _edge_mlp_onehot_kernel(idx_ref, eT_ref, psT_ref, prT_ref, w1eT_ref,
                            b1_ref, w2T_ref, b2_ref, outT_ref):
    """Fused gather + 2-layer edge MLP.

      h^T [H, tile] = P_s^T @ onehot(senders) + P_r^T @ onehot(receivers)
                      + W1e^T @ e^T + b1
      y^T [Dout, tile] = W2^T @ relu(h^T) + b2
    """
    n_nodes = psT_ref.shape[1]
    tile_e = idx_ref.shape[1]

    # One-hot gather operands from the streamed indices (compare + cast only;
    # the row selection itself rides the MXU dots below).
    node_ids = lax.broadcasted_iota(jnp.int32, (n_nodes, tile_e), 0)
    oh_s = (idx_ref[0:1, :] == node_ids).astype(jnp.bfloat16)   # [N, tile_e]
    oh_r = (idx_ref[1:2, :] == node_ids).astype(jnp.bfloat16)

    # Linear-1 (gather fused: P_s/P_r are node_attr already projected through
    # the sender / receiver halves of w1).
    h = jnp.dot(psT_ref[...], oh_s, preferred_element_type=jnp.float32)
    h = h + jnp.dot(prT_ref[...], oh_r, preferred_element_type=jnp.float32)
    h = h + jnp.dot(w1eT_ref[...], eT_ref[...],
                    preferred_element_type=jnp.float32)
    h = jnp.maximum(h + b1_ref[...], 0.0)                       # [H, tile_e]

    # Linear-2.
    y = jnp.dot(w2T_ref[...], h.astype(jnp.bfloat16),
                preferred_element_type=jnp.float32)             # [Dout, tile_e]
    outT_ref[...] = (y + b2_ref[...]).astype(outT_ref.dtype)


def _edge_mlp_gathered_kernel(gT_ref, eT_ref, w1eT_ref, b1_ref, w2T_ref,
                              b2_ref, outT_ref):
    """Edge MLP on pre-gathered, pre-projected node features (large-N path)."""
    h = gT_ref[...].astype(jnp.float32)
    h = h + jnp.dot(w1eT_ref[...], eT_ref[...],
                    preferred_element_type=jnp.float32)
    h = jnp.maximum(h + b1_ref[...], 0.0)
    y = jnp.dot(w2T_ref[...], h.astype(jnp.bfloat16),
                preferred_element_type=jnp.float32)
    outT_ref[...] = (y + b2_ref[...]).astype(outT_ref.dtype)


# --------------------------------------------------------------------------
# Wrapper
# --------------------------------------------------------------------------

def edge_mlp_pallas(node_attr, senders_idx, receivers_idx, edge_attr, params,
                    *, max_tile=2048, max_onehot_nodes=1024):
    """Edge MLP (gather + concat-MLP) fused into a single Pallas kernel.

    NOTE: MXU operands are bf16 with f32 accumulation (documented contract);
    out-of-range indices produce all-zero gathered rows instead of erroring
    like torch advanced indexing.
    """
    w1, b1, w2, b2 = params["w1"], params["b1"], params["w2"], params["b2"]
    n_nodes, dn = node_attr.shape
    n_edges, de = edge_attr.shape
    din, hidden = w1.shape
    dout = w2.shape[1]
    assert din == 2 * dn + de, "w1 must take 2*Dn + De input features"

    use_onehot = n_nodes <= max_onehot_nodes

    tile_e = _pick_tile(n_edges, max_tile, n_nodes if use_onehot else None)
    e_pad = _round_up(n_edges, tile_e)
    pad = e_pad - n_edges

    s_idx = senders_idx.astype(jnp.int32)
    r_idx = receivers_idx.astype(jnp.int32)

    # Fuse the gather with Linear-1: project the node table through the
    # sender / receiver halves of w1 once, in f32, in the wrapper.
    p_s = node_attr @ w1[:dn]                                   # [N, H] f32
    p_r = node_attr @ w1[dn:2 * dn]                             # [N, H] f32

    # Edges-on-lanes streamed / resident operands.
    eT = jnp.pad(edge_attr, ((0, pad), (0, 0))).T.astype(jnp.bfloat16)  # [De, e_pad]
    w1eT = w1[2 * dn:].T.astype(jnp.bfloat16)                   # [H, De]
    w2T = w2.T.astype(jnp.bfloat16)                             # [Dout, H]
    b1c = b1.reshape(hidden, 1).astype(jnp.float32)             # [H, 1]
    b2c = b2.reshape(dout, 1).astype(jnp.float32)               # [Dout, 1]

    grid = (e_pad // tile_e,)
    stream = lambda i: (0, i)

    if use_onehot:
        # Single streamed (2, e_pad) index tile; padded entries gather row 0
        # (their output columns are sliced off below).
        idx = jnp.pad(jnp.stack([s_idx, r_idx], axis=0), ((0, 0), (0, pad)))
        psT = p_s.T.astype(jnp.bfloat16)                        # [H, N]
        prT = p_r.T.astype(jnp.bfloat16)                        # [H, N]

        in_specs = [
            pl.BlockSpec((2, tile_e), stream),      # senders/receivers idx
            pl.BlockSpec((de, tile_e), stream),     # edge features^T
            _const_spec((hidden, n_nodes)),         # P_s^T (resident)
            _const_spec((hidden, n_nodes)),         # P_r^T (resident)
            _const_spec((hidden, de)),              # w1_e^T
            _const_spec((hidden, 1)),               # b1
            _const_spec((dout, hidden)),            # w2^T
            _const_spec((dout, 1)),                 # b2
        ]
        operands = (idx, eT, psT, prT, w1eT, b1c, w2T, b2c)
        kernel = _edge_mlp_onehot_kernel
        vmem_need = _onehot_vmem_bytes(n_nodes, de, hidden, dout, tile_e)
    else:
        # Large node table: gather the pre-projected rows with an XLA gather
        # in the wrapper and stream the summed projection.
        g = p_s[s_idx] + p_r[r_idx]                             # [E, H] f32
        gT = jnp.pad(g, ((0, pad), (0, 0))).T.astype(jnp.bfloat16)  # [H, e_pad]
        in_specs = [
            pl.BlockSpec((hidden, tile_e), stream),  # gathered projection^T
            pl.BlockSpec((de, tile_e), stream),      # edge features^T
            _const_spec((hidden, de)),               # w1_e^T
            _const_spec((hidden, 1)),                # b1
            _const_spec((dout, hidden)),             # w2^T
            _const_spec((dout, 1)),                  # b2
        ]
        operands = (gT, eT, w1eT, b1c, w2T, b2c)
        kernel = _edge_mlp_gathered_kernel
        vmem_need = ((hidden * de + dout * hidden) * 2
                     + (hidden + dout) * 4 * 128
                     + 2 * tile_e * (hidden * 2 + de * 2 + dout * 4)
                     + (hidden + dout) * tile_e * 4)

    cp_kwargs = dict(dimension_semantics=("parallel",))
    if vmem_need > 12 * 1024 * 1024:
        # v5e's default scoped VMEM limit is only 16 MiB (32 MiB v6e/v7x);
        # raise it just enough, staying under the smallest physical budget.
        cp_kwargs["vmem_limit_bytes"] = int(
            min(max(int(vmem_need * 1.5), 32 * 1024 * 1024), 56 * 1024 * 1024))

    outT = pl.pallas_call(
        kernel,
        out_shape=jax.ShapeDtypeStruct((dout, e_pad), jnp.float32),
        grid_spec=pltpu.PrefetchScalarGridSpec(
            num_scalar_prefetch=0,
            grid=grid,
            in_specs=in_specs,
            out_specs=pl.BlockSpec((dout, tile_e), stream),
        ),
        compiler_params=pltpu.CompilerParams(**cp_kwargs),
    )(*operands)

    # TODO(synk): emit bfloat16 output instead if downstream consumers accept
    # it (halves output HBM writeback bytes).
    return outT[:, :n_edges].T


def edge_block_forward(node_attr, edge_index, edge_attr, params):
    """JAX/Pallas equivalent of EdgeBlock.forward.

    Returns a dict mirroring torch_geometric.Data(x, edge_attr, edge_index).
    """
    new_edge_attr = edge_mlp_pallas(node_attr, edge_index[0], edge_index[1],
                                    edge_attr, params)
    return {"x": node_attr, "edge_attr": new_edge_attr,
            "edge_index": edge_index}


def _reference_forward(node_attr, edge_index, edge_attr, params):
    s = node_attr[edge_index[0]]
    r = node_attr[edge_index[1]]
    x = jnp.concatenate([s, r, edge_attr], axis=1)
    h = jnp.maximum(x @ params["w1"] + params["b1"], 0.0)
    return h @ params["w2"] + params["b2"]


if __name__ == "__main__":
    key = jax.random.PRNGKey(0)
    k_node, k_edge, k_idx, k_w1, k_b1, k_w2, k_b2 = jax.random.split(key, 7)

    # Small, module-consistent shapes (E intentionally NOT a tile multiple).
    N = 16        # number of nodes
    Dn = 8        # node feature dim
    De = 4        # edge feature dim
    E = 1000      # number of edges
    H = 32        # MLP hidden dim
    Dout = 16     # edge MLP output dim

    node_attr = jax.random.normal(k_node, (N, Dn), dtype=jnp.float32)
    edge_attr = jax.random.normal(k_edge, (E, De), dtype=jnp.float32)
    edge_index = jax.random.randint(k_idx, (2, E), 0, N, dtype=jnp.int32)

    Din = 2 * Dn + De
    params = {
        "w1": jax.random.normal(k_w1, (Din, H), dtype=jnp.float32)
              * (1.0 / jnp.sqrt(Din)),
        "b1": jax.random.normal(k_b1, (1, H), dtype=jnp.float32) * 0.01,
        "w2": jax.random.normal(k_w2, (H, Dout), dtype=jnp.float32)
              * (1.0 / jnp.sqrt(H)),
        "b2": jax.random.normal(k_b2, (1, Dout), dtype=jnp.float32) * 0.01,
    }

    ref = _reference_forward(node_attr, edge_index, edge_attr, params)

    # Main path: fused one-hot gather (small node table, VMEM-resident).
    out = edge_block_forward(node_attr, edge_index, edge_attr, params)
    jax.block_until_ready(out["edge_attr"])
    assert out["edge_attr"].shape == (E, Dout)
    assert jnp.allclose(out["edge_attr"], ref, atol=5e-2, rtol=5e-2), \
        "Pallas one-hot-gather kernel output mismatch vs reference"

    # Large-N fallback path (wrapper-side gather of pre-projected tables),
    # forced on the same data to verify it as a real code path.
    out_fb = edge_mlp_pallas(node_attr, edge_index[0], edge_index[1],
                             edge_attr, params, max_onehot_nodes=0)
    jax.block_until_ready(out_fb)
    assert out_fb.shape == (E, Dout)
    assert jnp.allclose(out_fb, ref, atol=5e-2, rtol=5e-2), \
        "Pallas gathered-MLP fallback kernel output mismatch vs reference"

    print("KERNEL_OK")
</pallas_src>

<mosaic_0001>
module attributes {stable_mosaic.version = 11 : i64} {
  func.func @_edge_mlp_onehot_kernel(%arg0: i32, %arg1: memref<2x256xi32, #tpu.memory_space<vmem>>, %arg2: memref<4x256xbf16, #tpu.memory_space<vmem>>, %arg3: memref<32x16xbf16, #tpu.memory_space<vmem>>, %arg4: memref<32x16xbf16, #tpu.memory_space<vmem>>, %arg5: memref<32x4xbf16, #tpu.memory_space<vmem>>, %arg6: memref<32x1xf32, #tpu.memory_space<vmem>>, %arg7: memref<16x32xbf16, #tpu.memory_space<vmem>>, %arg8: memref<16x1xf32, #tpu.memory_space<vmem>>, %arg9: memref<16x256xf32, #tpu.memory_space<vmem>>) attributes {dimension_semantics = [#tpu.dimension_semantics<parallel>], iteration_bounds = array<i64: 4>, scalar_prefetch = 0 : i64, scratch_operands = 0 : i64, tpu.core_type = #tpu.core_type<tc>, window_params = [{transform_indices = @transform_0, window_bounds = array<i64: 2, 256>}, {transform_indices = @transform_1, window_bounds = array<i64: 4, 256>}, {pipeline_mode = #tpu.pipeline_mode<synchronous>, transform_indices = @transform_2, window_bounds = array<i64: 32, 16>}, {pipeline_mode = #tpu.pipeline_mode<synchronous>, transform_indices = @transform_3, window_bounds = array<i64: 32, 16>}, {pipeline_mode = #tpu.pipeline_mode<synchronous>, transform_indices = @transform_4, window_bounds = array<i64: 32, 4>}, {pipeline_mode = #tpu.pipeline_mode<synchronous>, transform_indices = @transform_5, window_bounds = array<i64: 32, 1>}, {pipeline_mode = #tpu.pipeline_mode<synchronous>, transform_indices = @transform_6, window_bounds = array<i64: 16, 32>}, {pipeline_mode = #tpu.pipeline_mode<synchronous>, transform_indices = @transform_7, window_bounds = array<i64: 16, 1>}, {transform_indices = @transform_8, window_bounds = array<i64: 16, 256>}]} {
    %0 = tpu.iota {dimensions = array<i32: 0>} : vector<16x256xi32>
    %c0 = arith.constant 0 : index
    %c0_0 = arith.constant 0 : index
    %1 = vector.load %arg1[%c0, %c0_0] : memref<2x256xi32, #tpu.memory_space<vmem>>, vector<1x256xi32>
    %2 = vector.broadcast %1 : vector<1x256xi32> to vector<16x256xi32>
    %3 = arith.cmpi eq, %2, %0 : vector<16x256xi32>
    %4 = arith.extui %3 : vector<16x256xi1> to vector<16x256xi32>
    %5 = arith.sitofp %4 : vector<16x256xi32> to vector<16x256xf32>
    %6 = arith.truncf %5 : vector<16x256xf32> to vector<16x256xbf16>
    %c1 = arith.constant 1 : index
    %c0_1 = arith.constant 0 : index
    %7 = vector.load %arg1[%c1, %c0_1] : memref<2x256xi32, #tpu.memory_space<vmem>>, vector<1x256xi32>
    %8 = vector.broadcast %7 : vector<1x256xi32> to vector<16x256xi32>
    %9 = arith.cmpi eq, %8, %0 : vector<16x256xi32>
    %10 = arith.extui %9 : vector<16x256xi1> to vector<16x256xi32>
    %11 = arith.sitofp %10 : vector<16x256xi32> to vector<16x256xf32>
    %12 = arith.truncf %11 : vector<16x256xf32> to vector<16x256xbf16>
    %c0_2 = arith.constant 0 : index
    %c0_3 = arith.constant 0 : index
    %13 = vector.load %arg3[%c0_2, %c0_3] : memref<32x16xbf16, #tpu.memory_space<vmem>>, vector<32x16xbf16>
    %cst = arith.constant dense<0.000000e+00> : vector<32x256xf32>
    %14 = tpu.matmul %13, %6, %cst {dimension_numbers = #tpu.dot_dimension_numbers<[1], [0], [0], [1], [0, 0, 1, 1], [], []>} : vector<32x16xbf16>, vector<16x256xbf16>, vector<32x256xf32> -> vector<32x256xf32>
    %c0_4 = arith.constant 0 : index
    %c0_5 = arith.constant 0 : index
    %15 = vector.load %arg4[%c0_4, %c0_5] : memref<32x16xbf16, #tpu.memory_space<vmem>>, vector<32x16xbf16>
    %cst_6 = arith.constant dense<0.000000e+00> : vector<32x256xf32>
    %16 = tpu.matmul %15, %12, %cst_6 {dimension_numbers = #tpu.dot_dimension_numbers<[1], [0], [0], [1], [0, 0, 1, 1], [], []>} : vector<32x16xbf16>, vector<16x256xbf16>, vector<32x256xf32> -> vector<32x256xf32>
    %17 = arith.addf %14, %16 : vector<32x256xf32>
    %c0_7 = arith.constant 0 : index
    %c0_8 = arith.constant 0 : index
    %18 = vector.load %arg5[%c0_7, %c0_8] : memref<32x4xbf16, #tpu.memory_space<vmem>>, vector<32x4xbf16>
    %c0_9 = arith.constant 0 : index
    %c0_10 = arith.constant 0 : index
    %19 = vector.load %arg2[%c0_9, %c0_10] : memref<4x256xbf16, #tpu.memory_space<vmem>>, vector<4x256xbf16>
    %cst_11 = arith.constant dense<0.000000e+00> : vector<32x256xf32>
    %20 = tpu.matmul %18, %19, %cst_11 {dimension_numbers = #tpu.dot_dimension_numbers<[1], [0], [0], [1], [0, 0, 1, 1], [], []>} : vector<32x4xbf16>, vector<4x256xbf16>, vector<32x256xf32> -> vector<32x256xf32>
    %21 = arith.addf %17, %20 : vector<32x256xf32>
    %c0_12 = arith.constant 0 : index
    %c0_13 = arith.constant 0 : index
    %22 = vector.load %arg6[%c0_12, %c0_13] : memref<32x1xf32, #tpu.memory_space<vmem>>, vector<32x1xf32>
    %23 = vector.broadcast %22 : vector<32x1xf32> to vector<32x256xf32>
    %24 = arith.addf %21, %23 : vector<32x256xf32>
    %cst_14 = arith.constant 0.000000e+00 : f32
    %25 = vector.broadcast %cst_14 : f32 to vector<32x256xf32>
    %26 = arith.maximumf %24, %25 : vector<32x256xf32>
    %c0_15 = arith.constant 0 : index
    %c0_16 = arith.constant 0 : index
    %27 = vector.load %arg7[%c0_15, %c0_16] : memref<16x32xbf16, #tpu.memory_space<vmem>>, vector<16x32xbf16>
    %28 = arith.truncf %26 : vector<32x256xf32> to vector<32x256xbf16>
    %cst_17 = arith.constant dense<0.000000e+00> : vector<16x256xf32>
    %29 = tpu.matmul %27, %28, %cst_17 {dimension_numbers = #tpu.dot_dimension_numbers<[1], [0], [0], [1], [0, 0, 1, 1], [], []>} : vector<16x32xbf16>, vector<32x256xbf16>, vector<16x256xf32> -> vector<16x256xf32>
    %c0_18 = arith.constant 0 : index
    %c0_19 = arith.constant 0 : index
    %30 = vector.load %arg8[%c0_18, %c0_19] : memref<16x1xf32, #tpu.memory_space<vmem>>, vector<16x1xf32>
    %31 = vector.broadcast %30 : vector<16x1xf32> to vector<16x256xf32>
    %32 = arith.addf %29, %31 : vector<16x256xf32>
    %c0_20 = arith.constant 0 : index
    %c0_21 = arith.constant 0 : index
    %33 = vector.load %arg9[%c0_20, %c0_21] : memref<16x256xf32, #tpu.memory_space<vmem>>, vector<16x256xf32>
    tpu.vector_store %arg9[%c0_20, %c0_21], %32 {strides = array<i32>} : memref<16x256xf32, #tpu.memory_space<vmem>>, vector<16x256xf32>,
    return
  }
  func.func @transform_0(%arg0: i32) -> (i32, i32) {
    %c0_i32 = arith.constant 0 : i32
    %c0_i32_0 = arith.constant 0 : i32
    return %c0_i32, %arg0 : i32, i32
  }
  func.func @transform_1(%arg0: i32) -> (i32, i32) {
    %c0_i32 = arith.constant 0 : i32
    %c0_i32_0 = arith.constant 0 : i32
    return %c0_i32, %arg0 : i32, i32
  }
  func.func @transform_2(%arg0: i32) -> (i32, i32) {
    %c0_i32 = arith.constant 0 : i32
    %c0_i32_0 = arith.constant 0 : i32
    %c0_i32_1 = arith.constant 0 : i32
    return %c0_i32, %c0_i32_0 : i32, i32
  }
  func.func @transform_3(%arg0: i32) -> (i32, i32) {
    %c0_i32 = arith.constant 0 : i32
    %c0_i32_0 = arith.constant 0 : i32
    %c0_i32_1 = arith.constant 0 : i32
    return %c0_i32, %c0_i32_0 : i32, i32
  }
  func.func @transform_4(%arg0: i32) -> (i32, i32) {
    %c0_i32 = arith.constant 0 : i32
    %c0_i32_0 = arith.constant 0 : i32
    %c0_i32_1 = arith.constant 0 : i32
    return %c0_i32, %c0_i32_0 : i32, i32
  }
  func.func @transform_5(%arg0: i32) -> (i32, i32) {
    %c0_i32 = arith.constant 0 : i32
    %c0_i32_0 = arith.constant 0 : i32
    %c0_i32_1 = arith.constant 0 : i32
    return %c0_i32, %c0_i32_0 : i32, i32
  }
  func.func @transform_6(%arg0: i32) -> (i32, i32) {
    %c0_i32 = arith.constant 0 : i32
    %c0_i32_0 = arith.constant 0 : i32
    %c0_i32_1 = arith.constant 0 : i32
    return %c0_i32, %c0_i32_0 : i32, i32
  }
  func.func @transform_7(%arg0: i32) -> (i32, i32) {
    %c0_i32 = arith.constant 0 : i32
    %c0_i32_0 = arith.constant 0 : i32
    %c0_i32_1 = arith.constant 0 : i32
    return %c0_i32, %c0_i32_0 : i32, i32
  }
  func.func @transform_8(%arg0: i32) -> (i32, i32) {
    %c0_i32 = arith.constant 0 : i32
    %c0_i32_0 = arith.constant 0 : i32
    return %c0_i32, %arg0 : i32, i32
  }
}

</mosaic_0001>

<bundles_post_ra>
// kernel: tpu_custom_call.1
= control target key start
LH: loop header
LB: loop body
LE: loop exit
PB: predicated region body
PF: predicated region fallthrough
CT: control target
= control target key end

     0   :  { %13 = vsyncpa [#allocation3], 0  ;;  %s1132_s0 = inlined_call_operand.vmem [shape: s32[2,1024], index: 0, kind: input, shape index: {}]   ;;  %s1133_s1 = inlined_call_operand.vmem [shape: bf16[4,1024], index: 1, kind: input, shape index: {}]   ;;  %s1134_s2 = inlined_call_operand.vmem [shape: bf16[32,16], index: 2, kind: input, shape index: {}]   ;;  %s1135_s3 = inlined_call_operand.vmem [shape: bf16[32,16], index: 3, kind: input, shape index: {}]   ;;  %s1136_s4 = inlined_call_operand.vmem [shape: bf16[32,4], index: 4, kind: input, shape index: {}]   ;;  %s1137_s5 = inlined_call_operand.vmem [shape: f32[32,1], index: 5, kind: input, shape index: {}]   ;;  %s1138_s6 = inlined_call_operand.vmem [shape: bf16[16,32], index: 6, kind: input, shape index: {}]   ;;  %s1139_s7 = inlined_call_operand.vmem [shape: f32[16,1], index: 7, kind: input, shape index: {}]   ;;  %s1140_s8 = inlined_call_operand.hbm [shape: f32[16,1024], index: 8, kind: output, shape index: {}]  }
   0x1   :  { %15 = vsyncpa [#allocation3 + $0x1], 0  ;;  %s993_s27 = smov 0   ;;  %s995_s28 = smov 0  }
   0x2   :  { %s997_s29 = smov 0   ;;  %s999_s30 = smov 0  }
   0x3 LB: > { %s1014_s9 = sadd.s32 4294967295, %s941_s30   ;;  %s751_s10 = sadd.s32 4294967294, %s941_s30   ;;  %s941_s30 = sphi %s999_s30, %s1146_s30   ;;  %s937_s29 = sphi %s997_s29, %s1145_s29   ;;  %s933_s28 = sphi %s995_s28, %s1144_s28   ;;  %s929_s27 = sphi %s993_s27, %s1143_s27  }
   0x4   : > { %s1018_s11 = sadd.s32 1, %s941_s30   ;;  %s206_s12 = sadd.s32 1, %s937_s29 }
   0x5   : > { %s203_s13 = ssub.s32 %s941_s30, %s1018_s11  ;;  %p216_p0 = scmp.ne.s32.totalorder %s937_s29, %s933_s28 }
   0x6   : > { %p204_p1 = scmp.eq.s32.totalorder %s203_s13, 0  ;;  %p217_p2 = scmp.eq.s32.totalorder %s1014_s9, 3 }
   0x7   : > { %p222_p3 = scmp.ne.s32.totalorder %s933_s28, %s929_s27  ;;  %p223_p4 = scmp.eq.s32.totalorder %s751_s10, 3 }
   0x8   : > { %s1029_s14 = scalar_select %p204_p1, %s937_s29, %s206_s12  }
   0x9   : > { %p1031_p5 = por %p217_p2, %p216_p0  ;;  %p1035_p6 = por %p223_p4, %p222_p3 }
   0xa   : > { %p754_p7 = scmp.ge.s32.totalorder %s941_s30, 1  ;;  %p277_p8 = scmp.lt.s32.totalorder %s941_s30, 5 }
   0xc   : > { %p278_p9 = pnand %p754_p7, %p277_p8 }
   0xd   : > { %s756_s17 = sshll.u32 (!%p278_p9), %s1014_s9, 1  ;;  %s313_s25 = sand.u32 (!%p278_p9), 1, %s933_s28  }
   0xe   : > { %281 = sbr.rel (%p278_p9) target bundleno = 375 (0x177), region = 52  ;;  %p317_p10 = scmp.lt.s32.totalorder (!%p278_p9), %s756_s17, 7 }
   0xf   : > { %s755_s26 = sshll.u32 (!%p278_p9), %s313_s25, 5  ;;  %s831_s10 = sshll.u32 (!%p278_p9), %s1014_s9, 4 }
  0x10   : > { %s315_s12 = scalar_lea.vmem (!%p278_p9), [#allocation2], %s755_s26  ;;  %s662_s9 = scalar_lea.sflag (!%p278_p9), [#allocation3], %s313_s25 }
  0x11   : > { %s674_s19 = sshll.u32 (!%p278_p9), %s315_s12, 4  ;;  %s899_s26 = scalar_lea.hbm (!%p278_p9), %s1140_s8, 128  ;;  %s1102_s19 = int_to_ptr.vmem [resolvable:$true] %s674_s19 }
  0x13   : > { %v330_v0 = vlaneseq  ;;  %s1148_s17 = smov (!%p317_p10, %s756_s17), 7  ;;  %v826_v10 = vld [vmem:[%s1135_s3] sm:$0xff]  ;;  %v943_v11 = vmov 1.0|1.0   ;;  %vm386_vm6 = vcmask 130048   ;;  %vm511_vm7 = vcmask 1041408  }
  0x14   : > { %s757_s18 = sshll.u32 %s1148_s17, 1  ;;  %v824_v12 = vld [vmem:[%s1134_s2] sm:$0xff]  ;;  %v944_v18 = vmov 0   ;;  %v827_v19 = vld [vmem:[%s1135_s3 + $0x8] sm:$0xff]  ;;  %v564_v21 = vld [vmem:[%s1137_s5 + $0x10] sm:$0xff]  ;;  %vm504_vm14 = vcmask 31744  }
  0x15   : > { %v331_v1 = vshrl.u32 %v330_v0, 7  ;;  %s320_s21 = scalar_lea.vmem %s1132_s0, %s757_s18  ;;  %s326_s24 = scalar_lea.vmem %s1133_s1, %s757_s18  ;;  %v562_v17 = vld [vmem:[%s1137_s5] sm:$0xff]  ;;  %877 = vset.pattern.permute.xlu1 %v944_v18  ;;  %876 = vset.pattern.permute.xlu0 %v944_v18  ;;  %v825_v20 = vld [vmem:[%s1134_s2 + $0x8] sm:$0xff]  ;;  %v565_v23 = vld [vmem:[%s1137_s5 + $0x18] sm:$0xff]  ;;  %vm625_vm15 = vcmask 261120  }
  0x16   : > { %v764_v3 = vld [vmem:[%s320_s21 + $0x1] ss:$2 sm:$0x3]  ;;  %v333_v7 = vld [vmem:[%s320_s21] ss:$2 sm:$0x3]  ;;  %568 = vperm.xlu1 %877, %v562_v17   ;;  %878 = vset.pattern.permute.xlu2 %v944_v18  ;;  %s673_s18 = scalar_lea.hbm %s1140_s8, %s831_s10 }
  0x17   : > { %v332_v2 = vadd.s32 8, %v331_v1  ;;  %v489_v4 = vld [vmem:[%s326_s24] sm:$0xf]  ;;  %v352_v5 = vperm.slane %v764_v3, 0  ;;  %v353_v6 = vperm.slane %v764_v3, 1  ;;  %v334_v8 = vperm.slane %v333_v7, 0  ;;  %578 = vperm.xlu0 %876, %v564_v21  }
  0x18   : > { %501 = vst [vmem:[#allocation1] ss:$4 sm:$0xff] %v489_v4  ;;  %v335_v9 = vperm.slane %v333_v7, 1  ;;  %v563_v22 = vld [vmem:[%s1137_s5 + $0x8] sm:$0xff]  ;;  %v828_v24 = vld [vmem:[%s1136_s4] sm:$0xff]  ;;  %s676_s20 = sshll.u32 %s673_s18, 4  ;;  %s677_s20 = int_to_ptr.hbm [resolvable:$true] %s676_s20 }
  0x19   : > { %vm354_vm0 = vcmp.eq.s32.totalorder %v352_v5, %v331_v1  ;;  %vm356_vm1 = vcmp.eq.s32.totalorder %v352_v5, %v332_v2  ;;  %vm355_vm2 = vcmp.eq.s32.totalorder %v353_v6, %v331_v1  ;;  %vm357_vm3 = vcmp.eq.s32.totalorder %v353_v6, %v332_v2  ;;  %v829_v25 = vld [vmem:[%s1136_s4 + $0x8] sm:$0xff]  ;;  %v608_v42 = vld [vmem:[%s1139_s7] sm:$0xff]  ;;  %s893_s21 = sshra.s32 %s677_s20, 4  ;;  %s894_s21 = int_to_ptr.hbm [resolvable:$true] %s893_s21 }
  0x1a   : > { %vm777_vm4 = vmpackc.low %vm356_vm1, %vm354_vm0  ;;  %vm336_vm8 = vcmp.eq.s32.totalorder %v334_v8, %v331_v1  ;;  %vm338_vm9 = vcmp.eq.s32.totalorder %v334_v8, %v332_v2  ;;  %vm337_vm10 = vcmp.eq.s32.totalorder %v335_v9, %v331_v1  ;;  %vm339_vm11 = vcmp.eq.s32.totalorder %v335_v9, %v332_v2  ;;  %612 = vperm.xlu2 %878, %v608_v42   ;;  %v609_v46 = vld [vmem:[%s1139_s7 + $0x8] sm:$0xff]  ;;  %s895_s22 = scalar_lea.hbm %s894_s21, 32  ;;  %p900_p0 = scmp.lt.s32.totalorder %s894_s21, %s1140_s8 }
  0x1b   : > { %778 = vmatpush.bf16.msk.msra.mxu0 %vm777_vm4, %v943_v11  ;;  %vm781_vm5 = vmpackc.low %vm357_vm3, %vm355_vm2  ;;  %p896_p11 = scmp.ne.s32.totalorder %s894_s21, %s895_s22  ;;  %p901_p1 = scmp.lt.s32.totalorder %s899_s26, %s895_s22 }
  0x1c   : > { %782 = vmatpush.bf16.msk.msra.mxu1 %vm781_vm5, %v943_v11  ;;  %vm793_vm12 = vmpackc.low %vm338_vm9, %vm336_vm8 }
  0x1d   : > { %794 = vmatpush.bf16.msk.msra.mxu2 %vm793_vm12, %v943_v11  ;;  %vm797_vm13 = vmpackc.low %vm339_vm11, %vm337_vm10  ;;  %p897_p12 = pnand %p896_p11, %p1031_p5  ;;  %p902_p2 = por %p901_p1, %p900_p0 }
  0x1e   : > { %779 = vmatmul.msk.bf16.vlgmr.msra.gmra.mxu0 %vm386_vm6, %v826_v10  ;;  %798 = vmatpush.bf16.msk.msra.mxu3 %vm797_vm13, %v943_v11 }
  0x1f   : > { %v502_v13 = vld.sshfl [vmem:[#allocation1] sm:$0xff pattern:$0x73625140]  ;;  %v503_v14 = vld.sshfl [vmem:[#allocation1 + $0x8] sm:$0xff pattern:$0x73625140]  ;;  %783 = vmatmul.msk.bf16.vlgmr.msra.gmra.mxu1 %vm386_vm6, %v826_v10  ;;  %573 = vperm.xlu1 %877, %v563_v22   ;;  %p898_p13 = pneg %p897_p12 }
  0x20   : > { %v512_v15 = vsel %vm511_vm7, %v502_v13, 0  ;;  %v514_v16 = vsel %vm511_vm7, %v503_v14, 0  ;;  %795 = vmatmul.msk.bf16.vlgmr.msra.gmra.mxu2 %vm386_vm6, %v824_v12  ;;  %583 = vperm.xlu0 %876, %v565_v23  }
  0x21   : > { %523 = vmatpush.bf16.msrb.mxu0 %v512_v15  ;;  %542 = vmatpush.bf16.msrb.mxu1 %v514_v16  ;;  %p903_p3 = pnand %p902_p2, %p898_p13 }
  0x22   : > { %799 = vmatmul.msk.bf16.vlgmr.msra.gmra.mxu3 %vm386_vm6, %v824_v12  ;;  %617 = vperm.xlu2 %878, %v609_v46  }
  0x2e   : > { %780 = vmatmul.msk.bf16.gmra.mxu0 %vm386_vm6, %v827_v19 }
  0x2f   : > { %784 = vmatmul.msk.bf16.gmra.mxu1 %vm386_vm6, %v827_v19 }
  0x30   : > { %796 = vmatmul.msk.bf16.gmra.mxu2 %vm386_vm6, %v825_v20 }
  0x32   : > { %800 = vmatmul.msk.bf16.gmra.mxu3 %vm386_vm6, %v825_v20 }
  0x3e   : > { %809 = vmatmul.msk.bf16.vlgmr.msrb.gmra.mxu0 %vm504_vm14, %v828_v24 }
  0x3f   : > { %811 = vmatmul.msk.bf16.vlgmr.msrb.gmra.mxu1 %vm504_vm14, %v828_v24 }
  0x4e   : > { %810 = vmatmul.msk.bf16.gmra.mxu0 %vm504_vm14, %v829_v25 }
  0x4f   : > { %812 = vmatmul.msk.bf16.gmra.mxu1 %vm504_vm14, %v829_v25 }
  0x88   : > { %v569_v45 = vpop.permute.xlu1 %568 }
  0x89   : > { %v579_v47 = vpop.permute.xlu0 %578 }
  0x91   : > { %v574_v0 = vpop.permute.xlu1 %573 }
  0x92   : > { %v584_v8 = vpop.permute.xlu0 %583 }
  0x9b   : > { %v402_v26 = vpop.f32.mrf.mxu0 }
  0x9c   : > { %v421_v27 = vpop.f32.mrf.mxu1 }
  0xa3   : > { %v404_v28 = vpop.f32.mrf.mxu0  ;;  %v456_v32 = vpop.f32.mrf.mxu2 }
  0xa4   : > { %v423_v29 = vpop.f32.mrf.mxu1  ;;  %v457_v58 = vadd.f32 %v456_v32, %v402_v26 }
  0xa5   : > { %v475_v33 = vpop.f32.mrf.mxu3 }
  0xa6   : > { %v476_v61 = vadd.f32 %v475_v33, %v421_v27 }
  0xab   : > { %v407_v30 = vpop.f32.mrf.mxu0  ;;  %v458_v36 = vpop.f32.mrf.mxu2 }
  0xac   : > { %v426_v31 = vpop.f32.mrf.mxu1  ;;  %v459_v53 = vadd.f32 %v458_v36, %v404_v28  ;;  %v830_v28 = vld [vmem:[%s1138_s6] sm:$0xff] }
  0xad   : > { %v477_v38 = vpop.f32.mrf.mxu3 }
  0xae   : > { %v478_v56 = vadd.f32 %v477_v38, %v423_v29  ;;  %v613_v29 = vpop.permute.xlu2 %612 }
  0xb3   : > { %v409_v34 = vpop.f32.mrf.mxu0  ;;  %v461_v43 = vpop.f32.mrf.mxu2 }
  0xb4   : > { %v428_v35 = vpop.f32.mrf.mxu1  ;;  %v462_v50 = vadd.f32 %v461_v43, %v407_v30 }
  0xb5   : > { %v480_v44 = vpop.f32.mrf.mxu3 }
  0xb6   : > { %v481_v51 = vadd.f32 %v480_v44, %v426_v31 }
  0xbb   : > { %v525_v37 = vpop.f32.mrf.mxu0  ;;  %v463_v52 = vpop.f32.mrf.mxu2 }
  0xbc   : > { %v544_v39 = vpop.f32.mrf.mxu1  ;;  %v464_v59 = vadd.f32 %v463_v52, %v409_v34  ;;  %v554_v2 = vadd.f32 %v525_v37, %v457_v58  ;;  %v618_v34 = vpop.permute.xlu2 %617 }
  0xbd   : > { %v482_v54 = vpop.f32.mrf.mxu3  ;;  %v555_v6 = vadd.f32 %v544_v39, %v476_v61 }
  0xbe   : > { %v483_v62 = vadd.f32 %v482_v54, %v428_v35  ;;  %v586_v14 = vadd.f32 %v569_v45, %v554_v2 }
  0xbf   : > { %v587_v17 = vadd.f32 %v569_v45, %v555_v6 }
  0xc0   : > { %v594_v24 = vmax.f32 %v586_v14, 0.0 }
  0xc1   : > { %v595_v25 = vmax.f32 %v587_v17, 0.0 }
  0xc3   : > { %v527_v40 = vpop.f32.mrf.mxu0 }
  0xc4   : > { %v546_v41 = vpop.f32.mrf.mxu1  ;;  %v556_v60 = vadd.f32 %v527_v40, %v459_v53 }
  0xc5   : > { %v557_v63 = vadd.f32 %v546_v41, %v478_v56 }
  0xc6   : > { %v588_v10 = vadd.f32 %v574_v0, %v556_v60 }
  0xc7   : > { %v589_v12 = vadd.f32 %v574_v0, %v557_v63 }
  0xc8   : > { %v596_v20 = vmax.f32 %v588_v10, 0.0 }
  0xc9   : > { %v597_v22 = vmax.f32 %v589_v12, 0.0 }
  0xca   : > { %v604_v26 = vpack.c.bf16 %v596_v20, %v594_v24 }
  0xcb   : > { %v530_v48 = vpop.f32.mrf.mxu0  ;;  %v605_v27 = vpack.c.bf16 %v597_v22, %v595_v25 }
  0xcc   : > { %v549_v49 = vpop.f32.mrf.mxu1  ;;  %v558_v55 = vadd.f32 %v530_v48, %v462_v50 }
  0xcd   : > { %v559_v57 = vadd.f32 %v549_v49, %v481_v51 }
  0xce   : > { %v590_v3 = vadd.f32 %v579_v47, %v558_v55 }
  0xcf   : > { %v591_v7 = vadd.f32 %v579_v47, %v559_v57 }
  0xd0   : > { %v598_v15 = vmax.f32 %v590_v3, 0.0 }
  0xd1   : > { %v599_v18 = vmax.f32 %v591_v7, 0.0 }
  0xd3   : > { %v532_v1 = vpop.f32.mrf.mxu0 }
  0xd4   : > { %v560_v4 = vadd.f32 %v532_v1, %v464_v59  ;;  %v551_v5 = vpop.f32.mrf.mxu1 }
  0xd5   : > { %v561_v9 = vadd.f32 %v551_v5, %v483_v62 }
  0xd6   : > { %v592_v11 = vadd.f32 %v584_v8, %v560_v4 }
  0xd7   : > { %v593_v13 = vadd.f32 %v584_v8, %v561_v9 }
  0xd8   : > { %v600_v16 = vmax.f32 %v592_v11, 0.0 }
  0xd9   : > { %v601_v19 = vmax.f32 %v593_v13, 0.0 }
  0xda   : > { %v606_v21 = vpack.c.bf16 %v600_v16, %v598_v15 }
  0xdb   : > { %v607_v23 = vpack.c.bf16 %v601_v19, %v599_v18 }
  0xdc   : > { %635 = vmatpush.bf16.msrb.mxu2 %v606_v21 }
  0xdd   : > { %649 = vmatpush.bf16.msrb.mxu3 %v607_v23 }
  0xe0   : > { %636 = vmatpush.bf16.msrb.mxu2 %v604_v26 }
  0xe1   : > { %650 = vmatpush.bf16.msrb.mxu3 %v605_v27 }
  0xe3   : > { %817 = vmatmul.msk.bf16.vlgmr.msrb.gmra.mxu2 %vm625_vm15, %v830_v28 }
  0xe4   : > { %818 = vmatmul.msk.bf16.vlgmr.msrb.gmra.mxu3 %vm625_vm15, %v830_v28 }
 0x166   : > { %v638_v30 = vpop.f32.mrf.mxu2 }
 0x167   : > { %v639_v31 = vadd.f32 %v638_v30, %v613_v29  ;;  %v652_v32 = vpop.f32.mrf.mxu3 }
 0x168   : > { %v653_v33 = vadd.f32 %v652_v32, %v613_v29 }
 0x169   : > { %657 = vst [vmem:[%s315_s12] sm:$0xff] %v639_v31 }
 0x16a   : > { %658 = vst [vmem:[%s315_s12 + $0x8] sm:$0xff] %v653_v33 }
 0x16e   : > { %v640_v35 = vpop.f32.mrf.mxu2 }
 0x16f   : > { %v641_v36 = vadd.f32 %v640_v35, %v618_v34  ;;  %v654_v37 = vpop.f32.mrf.mxu3 }
 0x170   : > { %v655_v38 = vadd.f32 %v654_v37, %v618_v34 }
 0x171   : > { %659 = vst [vmem:[%s315_s12 + $0x10] sm:$0xff] %v641_v36 }
 0x172   : > { %660 = vst [vmem:[%s315_s12 + $0x18] sm:$0xff] %v655_v38 }
 0x173   : > { %906 = shalt.err (!%p903_p3)
}
 0x174   : > { %s945_s25 = smov 256   ;;  %s946_s12 = smov 1024  }
 0x175   : > { %s947_s17 = smov 16  }
 0x176   : > { %832 = dma.vmem_to_hbm [thread:$0]  (%p1031_p5), %s1102_s19, 512, %s677_s20, %s662_s9, %s945_s25, %s946_s12, %s947_s17  }
 0x177 PF: > { %p838_p4 = scmp.ge.s32.totalorder %s941_s30, 2  ;;  %s691_s18 = sand.u32 1, %s929_s27  }
 0x178   : > { %s692_s21 = scalar_lea.sflag [#allocation3], %s691_s18 }
 0x179   : > { %p835_p7 = pnand %p838_p4, %p1035_p6 }
 0x17b   : > { %p836_p8 = pneg %p835_p7 }
 0x17d   : > { %924 = dma.done.wait (%p836_p8), %s692_s21, 512  }
 0x17e   : > { %926 = vsyncadd (%p836_p8), %s692_s21, 4294966784  ;;  %p18_p9 = scmp.ge.s32.totalorder %s1018_s11, 6   ;;  %s1143_s27 = smov %s933_s28 }
 0x17f   : > { %s1144_s28 = smov %s937_s29  ;;  %s1145_s29 = smov %s1029_s14 }
 0x180   : > { %s1146_s30 = smov %s1018_s11  ;;  %20 = sbr.rel (!%p18_p9) target bundleno = 3 (0x3), region = 91 }
 0x185   :  { %698 = vsyncpa [#allocation3], 1 }
 0x186   :  { %700 = vsyncpa [#allocation3 + $0x1], 1 }

</bundles_post_ra>
